<compile_context>
chip_gen: v6e
topology: v6e:2x2x1
jax: 0.10.0
libtpu: 0.0.40
codegen_flags: <defaults>
</compile_context>

<pallas_src>
import math
import functools

import jax
import jax.numpy as jnp
from jax.experimental import pallas as pl
from jax.experimental.pallas import tpu as pltpu


# ----------------------------------------------------------------------------
# PE table construction (parameter setup, identical math to the PyTorch init).
# Note: the reference module writes sin(...) to BOTH even and odd columns —
# we reproduce that exactly.
# ----------------------------------------------------------------------------
def make_pe_table(d_model: int, max_len: int = 5000) -> jnp.ndarray:
    position = jnp.arange(0, max_len, dtype=jnp.float32)[:, None]            # (L, 1)
    div_term = jnp.exp(
        jnp.arange(0, d_model, 2, dtype=jnp.float32)
        * (-math.log(10000.0) / d_model)
    )                                                                          # (d/2,)
    s = jnp.sin(position * div_term)                                           # (L, d/2)
    pe = jnp.zeros((max_len, d_model), dtype=jnp.float32)
    pe = pe.at[:, 0::2].set(s)
    pe = pe.at[:, 1::2].set(s)
    return pe                                                                  # (L, d)


# ----------------------------------------------------------------------------
# Pallas kernels
# ----------------------------------------------------------------------------
def _add_pe_kernel(x_ref, pe_ref, o_ref):
    # eval-mode forward: out = x + pe   (pe broadcast over the batch axis)
    x = x_ref[...]                       # (TS, B, D)
    pe = pe_ref[...]                     # (TS, D)
    o_ref[...] = (x + pe[:, None, :]).astype(o_ref.dtype)


def _add_pe_dropout_kernel(x_ref, pe_ref, keep_ref, o_ref, *, scale: float):
    # training-mode forward: out = where(keep, (x + pe) * 1/(1-p), 0)
    x = x_ref[...]                       # (TS, B, D)
    pe = pe_ref[...]                     # (TS, D)
    y = x + pe[:, None, :]
    keep = keep_ref[...] != 0            # uint8 -> bool, no float temporaries
    o_ref[...] = jnp.where(keep, y * scale, 0.0).astype(o_ref.dtype)


# ----------------------------------------------------------------------------
# Tile sizing: keep each (TS, B, D) block around a few MiB so double-buffered
# inputs + output fit comfortably inside scoped VMEM on v5e (16 MiB default),
# v6e (32 MiB) and v7x (32 MiB scoped / 64 MiB physical).
# ----------------------------------------------------------------------------
_EVAL_BLOCK_BYTES = 2 * 1024 * 1024
_TRAIN_BLOCK_BYTES = 1 * 1024 * 1024      # training holds x + mask + out per tile
_VMEM_LIMIT_BYTES = 32 * 1024 * 1024


def _choose_seq_tile(S, B, D, itemsize, target_block_bytes):
    bytes_per_row = B * D * itemsize
    rows = max(1, int(target_block_bytes // bytes_per_row))
    if rows >= S:
        return S
    if rows >= 8:
        rows = (rows // 8) * 8            # keep seq tile sublane-friendly
    return max(1, min(rows, S))


# ----------------------------------------------------------------------------
# Wrapper
# ----------------------------------------------------------------------------
def positional_encoding_forward(x, pe_table, *, dropout_p=0.1,
                                training=False, rng_key=None):
    """x: (seq_len, batch, d_model). Returns same shape/dtype."""
    S, B, D = x.shape
    pe_slice = pe_table[:S, :].astype(x.dtype)        # matches self.pe[:x.size(0)]
    out_shape = jax.ShapeDtypeStruct((S, B, D), x.dtype)

    apply_dropout = bool(training) and float(dropout_p) > 0.0
    target = _TRAIN_BLOCK_BYTES if apply_dropout else _EVAL_BLOCK_BYTES
    TS = _choose_seq_tile(S, B, D, jnp.dtype(x.dtype).itemsize, target)
    grid = (pl.cdiv(S, TS),)

    x_spec = pl.BlockSpec((TS, B, D), lambda s: (s, 0, 0))
    # PE index_map depends only on the seq-tile index -> DMA'd once per tile.
    pe_spec = pl.BlockSpec((TS, D), lambda s: (s, 0))
    out_spec = pl.BlockSpec((TS, B, D), lambda s: (s, 0, 0))

    compiler_params = pltpu.CompilerParams(
        dimension_semantics=("parallel",),            # megacore sharding on v7x
        vmem_limit_bytes=_VMEM_LIMIT_BYTES,
    )

    if not apply_dropout:
        return pl.pallas_call(
            _add_pe_kernel,
            out_shape=out_shape,
            grid=grid,
            in_specs=[x_spec, pe_spec],
            out_specs=out_spec,
            input_output_aliases={0: 0},              # write result over x
            compiler_params=compiler_params,
        )(x, pe_slice)

    if rng_key is None:
        rng_key = jax.random.PRNGKey(0)
    keep = jax.random.bernoulli(
        rng_key, 1.0 - float(dropout_p), (S, B, D)).astype(jnp.uint8)
    mask_spec = pl.BlockSpec((TS, B, D), lambda s: (s, 0, 0))
    scale = 1.0 / (1.0 - float(dropout_p))
    kernel = functools.partial(_add_pe_dropout_kernel, scale=scale)

    return pl.pallas_call(
        kernel,
        out_shape=out_shape,
        grid=grid,
        in_specs=[x_spec, pe_spec, mask_spec],
        out_specs=out_spec,
        input_output_aliases={0: 0},
        compiler_params=compiler_params,
    )(x, pe_slice, keep)


# ----------------------------------------------------------------------------
# Main
# ----------------------------------------------------------------------------
if __name__ == "__main__":
    seq_len, batch, d_model = 8, 2, 32
    max_len = 64  # small synthetic max_len (>= seq_len)
    p = 0.1

    key = jax.random.PRNGKey(0)
    kx, kd = jax.random.split(key)
    x = jax.random.normal(kx, (seq_len, batch, d_model), dtype=jnp.float32)
    pe_table = make_pe_table(d_model, max_len)

    # Eval-mode forward (dropout is identity) — deterministic, check vs reference.
    out = positional_encoding_forward(x, pe_table, dropout_p=p, training=False)
    out = jax.block_until_ready(out)
    ref = x + pe_table[:seq_len][:, None, :]
    assert out.shape == (seq_len, batch, d_model)
    assert jnp.allclose(out, ref, atol=1e-6, rtol=1e-6)

    # Training-mode forward: every element is either 0 (dropped) or scaled (x+pe).
    out_train = positional_encoding_forward(
        x, pe_table, dropout_p=p, training=True, rng_key=kd)
    out_train = jax.block_until_ready(out_train)
    assert out_train.shape == (seq_len, batch, d_model)
    scaled_ref = ref / (1.0 - p)
    ok = jnp.isclose(out_train, 0.0, atol=1e-6) | jnp.isclose(
        out_train, scaled_ref, atol=1e-5, rtol=1e-5)
    assert bool(jnp.all(ok))

    print("KERNEL_OK")
</pallas_src>

<mosaic_0001>
module attributes {stable_mosaic.version = 11 : i64} {
  func.func @_add_pe_kernel(%arg0: i32, %arg1: memref<8x2x32xf32, #tpu.memory_space<vmem>>, %arg2: memref<8x32xf32, #tpu.memory_space<vmem>>, %arg3: memref<8x2x32xf32, #tpu.memory_space<vmem>>) attributes {dimension_semantics = [#tpu.dimension_semantics<parallel>], iteration_bounds = array<i64: 1>, scalar_prefetch = 0 : i64, scratch_operands = 0 : i64, tpu.core_type = #tpu.core_type<tc>, window_params = [{transform_indices = @transform_0, window_bounds = array<i64: 8, 2, 32>}, {transform_indices = @transform_1, window_bounds = array<i64: 8, 32>}, {transform_indices = @transform_2, window_bounds = array<i64: 8, 2, 32>}]} {
    %c0 = arith.constant 0 : index
    %c0_0 = arith.constant 0 : index
    %c0_1 = arith.constant 0 : index
    %0 = vector.load %arg1[%c0, %c0_0, %c0_1] : memref<8x2x32xf32, #tpu.memory_space<vmem>>, vector<8x2x32xf32>
    %c0_2 = arith.constant 0 : index
    %c0_3 = arith.constant 0 : index
    %1 = vector.load %arg2[%c0_2, %c0_3] : memref<8x32xf32, #tpu.memory_space<vmem>>, vector<8x32xf32>
    %2 = vector.shape_cast %1 : vector<8x32xf32> to vector<8x1x32xf32>
    %3 = vector.broadcast %2 : vector<8x1x32xf32> to vector<8x2x32xf32>
    %4 = arith.addf %0, %3 : vector<8x2x32xf32>
    %c0_4 = arith.constant 0 : index
    %c0_5 = arith.constant 0 : index
    %c0_6 = arith.constant 0 : index
    %5 = vector.load %arg3[%c0_4, %c0_5, %c0_6] : memref<8x2x32xf32, #tpu.memory_space<vmem>>, vector<8x2x32xf32>
    tpu.vector_store %arg3[%c0_4, %c0_5, %c0_6], %4 {strides = array<i32>} : memref<8x2x32xf32, #tpu.memory_space<vmem>>, vector<8x2x32xf32>,
    return
  }
  func.func @transform_0(%arg0: i32) -> (i32, i32, i32) {
    %c0_i32 = arith.constant 0 : i32
    %c0_i32_0 = arith.constant 0 : i32
    %c0_i32_1 = arith.constant 0 : i32
    return %arg0, %c0_i32, %c0_i32_0 : i32, i32, i32
  }
  func.func @transform_1(%arg0: i32) -> (i32, i32) {
    %c0_i32 = arith.constant 0 : i32
    %c0_i32_0 = arith.constant 0 : i32
    return %arg0, %c0_i32 : i32, i32
  }
  func.func @transform_2(%arg0: i32) -> (i32, i32, i32) {
    %c0_i32 = arith.constant 0 : i32
    %c0_i32_0 = arith.constant 0 : i32
    %c0_i32_1 = arith.constant 0 : i32
    return %arg0, %c0_i32, %c0_i32_0 : i32, i32, i32
  }
}

</mosaic_0001>

<bundles_post_ra>
// kernel: tpu_custom_call.1
= control target key start
LH: loop header
LB: loop body
LE: loop exit
PB: predicated region body
PF: predicated region fallthrough
CT: control target
= control target key end

     0   :  { %7 = vsyncpa [#allocation3], 0  ;;  %s251_s0 = inlined_call_operand.hbm [shape: f32[8,2,32], index: 0, kind: input, shape index: {}, may-alias: {0,2}]   ;;  %s252_s1 = inlined_call_operand.vmem [shape: f32[8,32], index: 1, kind: input, shape index: {}]   ;;  %s253_s2 = inlined_call_operand.hbm [shape: f32[8,2,32], index: 2, kind: output, shape index: {}, may-alias: {0,2}]  }
   0x1   :  { %8 = vsyncpa [#allocation4], 0  ;;  %s208_s9 = smov [#allocation2]  }
   0x2   :  { %s14_s10 = sshll.u32 %s208_s9, 4  ;;  %s15_s10 = int_to_ptr.vmem [resolvable:$true] %s14_s10 }
   0x3   :  { %s172_s11 = scalar_lea.vmem %s15_s10, 256  ;;  %p177_p1 = scmp.lt.s32.totalorder %s15_s10, %s15_s10 }
   0x4   :  { %p173_p0 = scmp.ne.s32.totalorder %s15_s10, %s172_s11  ;;  %p178_p2 = scmp.lt.s32.totalorder %s172_s11, %s172_s11 }
   0x6   :  { %p179_p3 = por %p178_p2, %p177_p1 }
   0x8   :  { %p180_p4 = pnand %p179_p3, %p173_p0 }
   0xa   :  { %183 = shalt.err (!%p180_p4)
}
   0xb   :  { %s209_s12 = smov 32   ;;  %s210_s13 = smov 2  }
   0xc   :  { %20 = dma.hbm_to_vmem [thread:$0]  %s251_s0, 256, %s15_s10, [#allocation3], %s209_s12, %s209_s12, %s210_s13  }
   0xd   :  { %204 = dma.done.wait [#allocation3], 256  }
   0xe   :  { %205 = vsyncadd [#allocation3], 4294967040  ;;  %v40_v0 = vlaneseq  ;;  %v211_v1 = vmov 1966171168   ;;  %v34_v6 = vld [vmem:[%s252_s1] sm:$0xff]  ;;  %vm133_vm0 = vcmask 254976  }
   0xf   :  { %v38_v2 = vunpack.c.l.s4 %v211_v1  ;;  %v36_v9 = vcombine.high %v34_v6, %v34_v6  ;;  %v26_v13 = vld [vmem:[#allocation2] sm:$0x3]  ;;  %v27_v18 = vld [vmem:[#allocation2 + $0x2] sm:$0x3]  ;;  %v28_v19 = vld [vmem:[#allocation2 + $0x4] sm:$0x3] }
  0x10   :  { %v41_v3 = vshrl.u32 %v40_v0, 7  ;;  %v30_v25 = vld [vmem:[#allocation2 + $0x8] sm:$0x3]  ;;  %v29_v26 = vld [vmem:[#allocation2 + $0x6] sm:$0x3]  ;;  %s212_s0 = smov [#allocation5]  }
  0x11   :  { %v39_v4 = vunpack.c.0.s8 %v38_v2  ;;  %v31_v33 = vld [vmem:[#allocation2 + $0xa] sm:$0x3]  ;;  %v32_v34 = vld [vmem:[#allocation2 + $0xc] sm:$0x3]  ;;  %v33_v40 = vld [vmem:[#allocation2 + $0xe] sm:$0x3] }
  0x12   :  { %v87_v8 = vsub.s32 0, %v41_v3  ;;  %s147_s1 = sshll.u32 %s212_s0, 4  ;;  %s148_s1 = int_to_ptr.vmem [resolvable:$true] %s147_s1 }
  0x13   :  { %v42_v5 = vsub.s32 %v39_v4, %v41_v3  ;;  %s184_s18 = scalar_lea.vmem %s148_s1, 256  ;;  %p189_p6 = scmp.lt.s32.totalorder %s148_s1, %s148_s1 }
  0x14   :  { %p185_p5 = scmp.ne.s32.totalorder %s148_s1, %s184_s18  ;;  %p190_p7 = scmp.lt.s32.totalorder %s184_s18, %s184_s18 }
  0x15   :  { %v43_v7 = vrot.slane %v34_v6, %v42_v5  ;;  %v50_v12 = vrot.slane %v36_v9, %v42_v5 }
  0x16   :  { %p191_p8 = por %p190_p7, %p189_p6 }
  0x17   :  { %v59_v10 = vrot.slane %v43_v7, %v42_v5  ;;  %v51_v11 = vcombine.high %v43_v7, %v43_v7  ;;  %v66_v17 = vrot.slane %v50_v12, %v42_v5  ;;  %v52_v20 = vcombine.high %v50_v12, %v50_v12 }
  0x18   :  { %p192_p9 = pnand %p191_p8, %p185_p5 }
  0x19   :  { %v88_v14 = vrot.slane %v59_v10, %v87_v8  ;;  %v73_v15 = vrot.slane %v51_v11, %v42_v5  ;;  %v81_v16 = vcombine.high %v59_v10, %v59_v10  ;;  %v104_v27 = vrot.slane %v66_v17, %v87_v8 }
  0x1a   :  { %v80_v28 = vrot.slane %v52_v20, %v42_v5  ;;  %v82_v29 = vcombine.high %v66_v17, %v66_v17 }
  0x1b   :  { %v125_v21 = vadd.f32 %v88_v14, %v26_v13  ;;  %v92_v22 = vrot.slane %v73_v15, %v87_v8  ;;  %v96_v23 = vrot.slane %v81_v16, %v87_v8  ;;  %v83_v24 = vcombine.high %v73_v15, %v73_v15 }
  0x1c   :  { %v129_v35 = vadd.f32 %v104_v27, %v30_v25  ;;  %v108_v36 = vrot.slane %v80_v28, %v87_v8  ;;  %v112_v37 = vrot.slane %v82_v29, %v87_v8  ;;  %v84_v38 = vcombine.high %v80_v28, %v80_v28 }
  0x1d   :  { %134 = vst.msk [vmem:[#allocation5] sm:$0x3] %vm133_vm0, %v125_v21  ;;  %v126_v30 = vadd.f32 %v92_v22, %v27_v18  ;;  %v127_v31 = vadd.f32 %v96_v23, %v28_v19  ;;  %v100_v32 = vrot.slane %v83_v24, %v87_v8 }
  0x1e   :  { %138 = vst.msk [vmem:[#allocation5 + $0x8] sm:$0x3] %vm133_vm0, %v129_v35  ;;  %v130_v41 = vadd.f32 %v108_v36, %v31_v33  ;;  %v131_v42 = vadd.f32 %v112_v37, %v32_v34  ;;  %v116_v43 = vrot.slane %v84_v38, %v87_v8 }
  0x1f   :  { %135 = vst.msk [vmem:[#allocation5 + $0x2] sm:$0x3] %vm133_vm0, %v126_v30  ;;  %136 = vst.msk [vmem:[#allocation5 + $0x4] sm:$0x3] %vm133_vm0, %v127_v31  ;;  %v128_v39 = vadd.f32 %v100_v32, %v29_v26 }
  0x20   :  { %139 = vst.msk [vmem:[#allocation5 + $0xa] sm:$0x3] %vm133_vm0, %v130_v41  ;;  %140 = vst.msk [vmem:[#allocation5 + $0xc] sm:$0x3] %vm133_vm0, %v131_v42  ;;  %v132_v44 = vadd.f32 %v116_v43, %v33_v40 }
  0x21   :  { %137 = vst.msk [vmem:[#allocation5 + $0x6] sm:$0x3] %vm133_vm0, %v128_v39 }
  0x22   :  { %141 = vst.msk [vmem:[#allocation5 + $0xe] sm:$0x3] %vm133_vm0, %v132_v44 }
  0x23   :  { %195 = shalt.err (!%p192_p9)
}
  0x24   :  { %153 = dma.vmem_to_hbm [thread:$0]  %s148_s1, 256, %s253_s2, [#allocation4], %s209_s12, %s209_s12, %s210_s13  }
  0x25   :  { %206 = dma.done.wait [#allocation4], 256  }
  0x26   :  { %207 = vsyncadd [#allocation4], 4294967040 }
  0x27   :  { %157 = vsyncpa [#allocation3], 1 }
  0x28   :  { %158 = vsyncpa [#allocation4], 1 }

</bundles_post_ra>
